<compile_context>
chip_gen: v7x
topology: tpu7x:2x2x1
jax: 0.10.0
libtpu: 0.0.40
codegen_flags: <defaults>
</compile_context>

<pallas_src>
import functools

import jax
import jax.numpy as jnp
from jax import lax
from jax.experimental import pallas as pl
from jax.experimental.pallas import tpu as pltpu


def relu_plain_kernel(x_ref, w1_ref, a_ref, o_ref, *, compute_dtype):
    # x_ref : (tb, d)   VMEM, stored dtype (cast in-kernel, hidden under DMA)
    # w1_ref: (m, d)    VMEM, native nn.Linear layout, stored dtype (resident)
    # a_ref : (m, 1)    VMEM, f32 (alpha_relu.weight, reshape only, resident)
    # o_ref : (1, tb)   VMEM, f32, lane-dense (batch mapped to lanes)
    x = x_ref[...].astype(compute_dtype)
    w = w1_ref[...].astype(compute_dtype)
    ht = lax.dot_general(
        w, x,
        dimension_numbers=(((1,), (1,)), ((), ())),   # contract the d dims
        preferred_element_type=jnp.float32)           # (m, tb) = (X @ W1^T)^T
    ht = jnp.maximum(ht, 0.0)                         # ReLU on f32 accumulator (VPU)
    # alpha layer (output width 1): VPU mul + sublane sum, not an N=1 MXU matmul.
    o_ref[...] = jnp.sum(ht * a_ref[...], axis=0, keepdims=True).astype(o_ref.dtype)


def _choose_tb(B):
    # VMEM-safe tile cap: at d=32, m=64 a 16384-row step is ~9 MiB (X tile
    # double-buffered + f32 (m, tb) intermediate) -> fine on v7x's 32 MiB
    # default scoped VMEM; v5e/v6e have even more headroom.
    TB_CAP = 16384
    if B <= TB_CAP:
        if B >= 4096 and B % 256 == 0:
            return B // 2   # two equal 128-multiple tiles: v7x megacore sharding
        return B            # one full-batch step: no padding, minimum overhead
    return TB_CAP           # huge B: big 128-multiple tiles; ragged tail masked


def relu_plain_forward(x, w_relu, alpha_relu, *, tb=None, compute_dtype=None):
    """x: (B, d); w_relu: (m, d) [native nn.Linear layout]; alpha_relu: (1, m).

    compute_dtype: None -> use x.dtype (exact module math for f32 inputs).
    jnp.bfloat16 halves MXU-input width on v5e/v6e/v7x (accuracy trade-off from
    input quantization; accumulation, ReLU and the reduction stay in f32).
    """
    B, d = x.shape
    m = w_relu.shape[0]
    assert w_relu.shape == (m, d) and alpha_relu.shape == (1, m)

    if compute_dtype is None:
        compute_dtype = x.dtype
    if tb is None:
        tb = _choose_tb(B)
    # (8,128) rule: x block needs tb % 8 == 0, output block needs tb % 128 == 0,
    # unless the block spans the full batch dimension.
    assert tb == B or tb % 128 == 0, "tb must be the full batch or a multiple of 128"

    # alpha: (1, m) -> (m, 1) is a pure reshape (identical element order), tiny.
    a_col = alpha_relu.reshape(m, 1).astype(jnp.float32)

    grid = (pl.cdiv(B, tb),)
    kernel = functools.partial(relu_plain_kernel, compute_dtype=compute_dtype)

    cost = pl.CostEstimate(
        flops=2 * B * m * d,
        bytes_accessed=(B * d * x.dtype.itemsize
                        + m * d * w_relu.dtype.itemsize
                        + m * 4                      # alpha column
                        + B * 4),                    # f32 output row
        transcendentals=0)

    out = pl.pallas_call(
        kernel,
        out_shape=jax.ShapeDtypeStruct((1, B), jnp.float32),
        grid_spec=pltpu.PrefetchScalarGridSpec(
            num_scalar_prefetch=0,
            grid=grid,
            in_specs=[
                pl.BlockSpec((tb, d), lambda i: (i, 0)),   # X tile (streamed)
                pl.BlockSpec((m, d), lambda i: (0, 0)),    # W_relu.weight (resident)
                pl.BlockSpec((m, 1), lambda i: (0, 0)),    # alpha column (resident)
            ],
            out_specs=pl.BlockSpec((1, tb), lambda i: (0, i)),  # lane-dense y row
        ),
        compiler_params=pltpu.CompilerParams(
            dimension_semantics=("parallel",),     # batch axis shards across TCs (v7x)
        ),
        cost_estimate=cost,
    )(x, w_relu, a_col)

    # (1, B) lane-dense row -> (B, 1) column; reshape only (same element order).
    return out.reshape(B, 1)


def reference_forward(x, w_relu, alpha_relu):
    h = jnp.maximum(x @ w_relu.T, 0.0)
    return h @ alpha_relu.T


if __name__ == "__main__":
    # Module hyper-params: m = hidden width, n unused, d = input dim.
    m, n, d = 64, 0, 32
    batch = 8

    key = jax.random.PRNGKey(0)
    kx, kw, ka = jax.random.split(key, 3)

    x = jax.random.normal(kx, (batch, d), dtype=jnp.float32)
    w_relu = jax.random.uniform(kw, (m, d), jnp.float32,
                                minval=-1.0 / d ** 0.5, maxval=1.0 / d ** 0.5)
    alpha_relu = jax.random.uniform(ka, (1, m), jnp.float32,
                                    minval=-1.0 / m ** 0.5, maxval=1.0 / m ** 0.5)

    y_ref = reference_forward(x, w_relu, alpha_relu)

    # f32 path: exact module semantics, single full-batch grid step.
    y = jax.block_until_ready(relu_plain_forward(x, w_relu, alpha_relu))
    assert y.shape == (batch, 1)
    assert jnp.allclose(y, y_ref, atol=1e-5, rtol=1e-5)

    # bf16 MXU-input path (in-kernel cast; f32 accumulation / ReLU / reduction).
    y_bf16 = jax.block_until_ready(
        relu_plain_forward(x, w_relu, alpha_relu, compute_dtype=jnp.bfloat16))
    assert jnp.allclose(y_bf16, y_ref, atol=5e-2, rtol=5e-2)

    # Larger batch: auto heuristic picks one big lane-dense step (no padding).
    B2 = 512
    x2 = jax.random.normal(kx, (B2, d), dtype=jnp.float32)
    y2 = jax.block_until_ready(relu_plain_forward(x2, w_relu, alpha_relu))
    assert jnp.allclose(y2, reference_forward(x2, w_relu, alpha_relu),
                        atol=1e-4, rtol=1e-4)

    # Ragged batch + multi-step tiled path: explicit small tb exercises the
    # masked ragged-tail store without needing a huge batch (and no jnp.pad).
    B3 = 300
    x3 = jax.random.normal(kx, (B3, d), dtype=jnp.float32)
    y3 = jax.block_until_ready(relu_plain_forward(x3, w_relu, alpha_relu, tb=128))
    assert y3.shape == (B3, 1)
    assert jnp.allclose(y3, reference_forward(x3, w_relu, alpha_relu),
                        atol=1e-4, rtol=1e-4)

    print("KERNEL_OK")
</pallas_src>

<mosaic_0001>
module attributes {stable_mosaic.version = 11 : i64} {
  func.func @relu_plain_kernel(%arg0: i32, %arg1: memref<8x32xf32, #tpu.memory_space<vmem>>, %arg2: memref<64x32xf32, #tpu.memory_space<vmem>>, %arg3: memref<64x1xf32, #tpu.memory_space<vmem>>, %arg4: memref<1x8xf32, #tpu.memory_space<vmem>>) attributes {dimension_semantics = [#tpu.dimension_semantics<parallel>], iteration_bounds = array<i64: 1>, scalar_prefetch = 0 : i64, scratch_operands = 0 : i64, tpu.core_type = #tpu.core_type<tc>, window_params = [{transform_indices = @transform_0, window_bounds = array<i64: 8, 32>}, {pipeline_mode = #tpu.pipeline_mode<synchronous>, transform_indices = @transform_1, window_bounds = array<i64: 64, 32>}, {pipeline_mode = #tpu.pipeline_mode<synchronous>, transform_indices = @transform_2, window_bounds = array<i64: 64, 1>}, {transform_indices = @transform_3, window_bounds = array<i64: 1, 8>}]} {
    %c0 = arith.constant 0 : index
    %c0_0 = arith.constant 0 : index
    %0 = vector.load %arg1[%c0, %c0_0] : memref<8x32xf32, #tpu.memory_space<vmem>>, vector<8x32xf32>
    %c0_1 = arith.constant 0 : index
    %c0_2 = arith.constant 0 : index
    %1 = vector.load %arg2[%c0_1, %c0_2] : memref<64x32xf32, #tpu.memory_space<vmem>>, vector<64x32xf32>
    %cst = arith.constant dense<0.000000e+00> : vector<64x8xf32>
    %2 = tpu.matmul %1, %0, %cst {dimension_numbers = #tpu.dot_dimension_numbers<[1], [1], [0], [0], [0, 0, 1, 0], [], []>} : vector<64x32xf32>, vector<8x32xf32>, vector<64x8xf32> -> vector<64x8xf32>
    %cst_3 = arith.constant 0.000000e+00 : f32
    %3 = vector.broadcast %cst_3 : f32 to vector<64x8xf32>
    %4 = arith.maximumf %2, %3 : vector<64x8xf32>
    %c0_4 = arith.constant 0 : index
    %c0_5 = arith.constant 0 : index
    %5 = vector.load %arg3[%c0_4, %c0_5] : memref<64x1xf32, #tpu.memory_space<vmem>>, vector<64x1xf32>
    %6 = vector.broadcast %5 : vector<64x1xf32> to vector<64x8xf32>
    %7 = arith.mulf %4, %6 : vector<64x8xf32>
    %cst_6 = arith.constant dense<0.000000e+00> : vector<8xf32>
    %8 = vector.multi_reduction <add>, %7, %cst_6 [0] : vector<64x8xf32> to vector<8xf32>
    %9 = vector.shape_cast %8 : vector<8xf32> to vector<1x8xf32>
    %c0_7 = arith.constant 0 : index
    %c0_8 = arith.constant 0 : index
    %10 = vector.load %arg4[%c0_7, %c0_8] : memref<1x8xf32, #tpu.memory_space<vmem>>, vector<1x8xf32>
    tpu.vector_store %arg4[%c0_7, %c0_8], %9 {strides = array<i32>} : memref<1x8xf32, #tpu.memory_space<vmem>>, vector<1x8xf32>,
    return
  }
  func.func @transform_0(%arg0: i32) -> (i32, i32) {
    %c0_i32 = arith.constant 0 : i32
    %c0_i32_0 = arith.constant 0 : i32
    return %arg0, %c0_i32 : i32, i32
  }
  func.func @transform_1(%arg0: i32) -> (i32, i32) {
    %c0_i32 = arith.constant 0 : i32
    %c0_i32_0 = arith.constant 0 : i32
    %c0_i32_1 = arith.constant 0 : i32
    return %c0_i32, %c0_i32_0 : i32, i32
  }
  func.func @transform_2(%arg0: i32) -> (i32, i32) {
    %c0_i32 = arith.constant 0 : i32
    %c0_i32_0 = arith.constant 0 : i32
    %c0_i32_1 = arith.constant 0 : i32
    return %c0_i32, %c0_i32_0 : i32, i32
  }
  func.func @transform_3(%arg0: i32) -> (i32, i32) {
    %c0_i32 = arith.constant 0 : i32
    %c0_i32_0 = arith.constant 0 : i32
    return %c0_i32, %arg0 : i32, i32
  }
}

</mosaic_0001>

<bundles_post_ra>
// kernel: tpu_custom_call.1
= control target key start
LH: loop header
LB: loop body
LE: loop exit
PB: predicated region body
PF: predicated region fallthrough
CT: control target
= control target key end

     0   :  { %vm24_vm0 = vcmask 261120   ;;  %v321_v7 = vmov 0   ;;  %s426_s0 = inlined_call_operand.vmem [shape: f32[8,32], index: 0, kind: input, shape index: {}]   ;;  %s427_s1 = inlined_call_operand.vmem [shape: f32[64,32], index: 1, kind: input, shape index: {}]   ;;  %s428_s2 = inlined_call_operand.vmem [shape: f32[64,1], index: 2, kind: input, shape index: {}]   ;;  %s429_s3 = inlined_call_operand.hbm [shape: f32[1,8], index: 3, kind: output, shape index: {}]  }
   0x1   :  { %v15_v0 = vld [vmem:[%s426_s0] sm:$0xff]  ;;  %v17_v3 = vld [vmem:[%s427_s1 + $0x8] sm:$0xff]  ;;  %v18_v5 = vld [vmem:[%s427_s1 + $0x10] sm:$0xff]  ;;  %295 = vset.pattern.permute.xlu0 %v321_v7  ;;  %296 = vset.pattern.permute.xlu1 %v321_v7 }
   0x2   :  { %v16_v1 = vld [vmem:[%s427_s1] sm:$0xff]  ;;  %277 = vmatprep.subr.msk.mxu0 %vm24_vm0, %v15_v0  ;;  %291 = vmatprep.subr.msk.mxu1 %vm24_vm0, %v15_v0  ;;  %v21_v4 = vld [vmem:[%s427_s1 + $0x28] sm:$0xff]  ;;  %v22_v6 = vld [vmem:[%s427_s1 + $0x30] sm:$0xff] }
   0x3   :  { %v20_v2 = vld [vmem:[%s427_s1 + $0x20] sm:$0xff]  ;;  %278 = vmatpush3.xpose.msk.msra.mxu0 %vm24_vm0, %v15_v0  ;;  %292 = vmatpush3.xpose.msk.msra.mxu1 %vm24_vm0, %v15_v0  ;;  %v167_v9 = vld [vmem:[%s428_s2 + $0x10] sm:$0xff] }
   0x4   :  { %279 = vmatprep.mubr.msk.f32.mxu0 %vm24_vm0, %v16_v1  ;;  %285 = vmatprep.mubr.msk.f32.mxu1 %vm24_vm0, %v20_v2  ;;  %v165_v8 = vld [vmem:[%s428_s2] sm:$0xff] }
   0x6   :  { %280 = vmatmul.mubr.msk.f32.vlgmr.msra.gmra.mrb[0].mxu0 %vm24_vm0, %v17_v3  ;;  %286 = vmatmul.mubr.msk.f32.vlgmr.msra.gmra.mrb[0].mxu1 %vm24_vm0, %v21_v4 }
   0x7   :  { %8 = vsyncpa [#allocation3], 0  ;;  %282 = vmatprep.mubr.msk.f32.mxu0 %vm24_vm0, %v18_v5  ;;  %288 = vmatprep.mubr.msk.f32.mxu1 %vm24_vm0, %v22_v6  ;;  %v19_v10 = vld [vmem:[%s427_s1 + $0x18] sm:$0xff]  ;;  %v166_v12 = vld [vmem:[%s428_s2 + $0x8] sm:$0xff]  ;;  %vm221_vm1 = vcmask 64512   ;;  %vm243_vm2 = vcmask 57344  }
   0x8   :  { %v23_v11 = vld [vmem:[%s427_s1 + $0x38] sm:$0xff]  ;;  %175 = vperm.xlu0 %295, %v165_v8   ;;  %185 = vperm.xlu1 %296, %v167_v9   ;;  %v169_v14 = vld [vmem:[%s428_s2 + $0x20] sm:$0xff]  ;;  %v170_v15 = vld [vmem:[%s428_s2 + $0x28] sm:$0xff] }
   0x9   :  { %v168_v13 = vld [vmem:[%s428_s2 + $0x18] sm:$0xff]  ;;  %v171_v16 = vld [vmem:[%s428_s2 + $0x30] sm:$0xff] }
   0xa   :  { %283 = vmatmul.mubr.msk.f32.gmra.mrb[2].mxu0 %vm24_vm0, %v19_v10  ;;  %289 = vmatmul.mubr.msk.f32.gmra.mrb[2].mxu1 %vm24_vm0, %v23_v11  ;;  %v172_v17 = vld [vmem:[%s428_s2 + $0x38] sm:$0xff]  ;;  %s322_s2 = smov [#allocation2]  }
   0xb   :  { %s251_s17 = sshll.u32 %s322_s2, 4  ;;  %s252_s17 = int_to_ptr.vmem [resolvable:$true] %s251_s17 }
   0xc   :  { %180 = vperm.xlu0 %295, %v166_v12   ;;  %190 = vperm.xlu1 %296, %v168_v13   ;;  %s297_s18 = scalar_lea.vmem %s252_s17, 16  ;;  %s301_s19 = scalar_lea.vmem %s252_s17, 32 }
   0xd   :  { %p298_p0 = scmp.ne.s32.totalorder %s252_s17, %s297_s18  ;;  %p302_p1 = scmp.lt.s32.totalorder %s252_s17, %s252_s17 }
   0xe   :  { %p303_p2 = scmp.lt.s32.totalorder %s301_s19, %s297_s18 }
  0x10   :  { %195 = vperm.xlu0 %295, %v169_v14   ;;  %200 = vperm.xlu1 %296, %v170_v15   ;;  %p304_p3 = por %p303_p2, %p302_p1 }
  0x12   :  { %p305_p4 = pnand %p304_p3, %p298_p0 }
  0x14   :  { %205 = vperm.xlu0 %295, %v171_v16   ;;  %210 = vperm.xlu1 %296, %v172_v17  }
  0x87   :  { %v176_v18 = vpop.permute.xlu0 %175  ;;  %v186_v19 = vpop.permute.xlu1 %185 }
  0x8b   :  { %v181_v20 = vpop.permute.xlu0 %180  ;;  %v191_v21 = vpop.permute.xlu1 %190 }
  0x8f   :  { %v196_v39 = vpop.permute.xlu0 %195  ;;  %v201_v40 = vpop.permute.xlu1 %200 }
  0x93   :  { %v206_v52 = vpop.permute.xlu0 %205  ;;  %v211_v53 = vpop.permute.xlu1 %210 }
  0xd9   :  { %v281_v22 = vpop.f32.mrb[0].mxu0  ;;  %v287_v23 = vpop.f32.mrb[0].mxu1 }
  0xda   :  { %v158_v24 = vmax.f32 %v281_v22, 0.0  ;;  %v118_v25 = vpop.f32.mrb[1].mxu0  ;;  %v138_v26 = vpop.f32.mrb[1].mxu1  ;;  %v162_v42 = vmax.f32 %v287_v23, 0.0 }
  0xdb   :  { %v157_v27 = vmax.f32 %v118_v25, 0.0  ;;  %v161_v37 = vmax.f32 %v138_v26, 0.0 }
  0xdc   :  { %v214_v28 = vmul.f32 %v181_v20, %v158_v24  ;;  %v218_v49 = vmul.f32 %v201_v40, %v162_v42 }
  0xdd   :  { %v213_v29 = vmul.f32 %v176_v18, %v157_v27  ;;  %v284_v30 = vpop.f32.mrb[2].mxu0  ;;  %v290_v31 = vpop.f32.mrb[2].mxu1  ;;  %v217_v45 = vmul.f32 %v196_v39, %v161_v37 }
  0xde   :  { %v223_v32 = vsel %vm221_vm1, %v214_v28, 0.0  ;;  %v160_v33 = vmax.f32 %v284_v30, 0.0  ;;  %v128_v34 = vpop.f32.mrb[3].mxu0  ;;  %v148_v35 = vpop.f32.mrb[3].mxu1  ;;  %v164_v51 = vmax.f32 %v290_v31, 0.0  ;;  %v231_v58 = vsel %vm221_vm1, %v218_v49, 0.0 }
  0xdf   :  { %v222_v36 = vsel %vm221_vm1, %v213_v29, 0.0  ;;  %v159_v38 = vmax.f32 %v128_v34, 0.0  ;;  %v163_v47 = vmax.f32 %v148_v35, 0.0  ;;  %v229_v55 = vsel %vm221_vm1, %v217_v45, 0.0 }
  0xe0   :  { %v224_v41 = vadd.f32 %v223_v32, %v222_v36  ;;  %v216_v43 = vmul.f32 %v191_v21, %v160_v33  ;;  %v220_v59 = vmul.f32 %v211_v53, %v164_v51 }
  0xe1   :  { %v215_v44 = vmul.f32 %v186_v19, %v159_v38  ;;  %v219_v56 = vmul.f32 %v206_v52, %v163_v47 }
  0xe2   :  { %v227_v50 = vsel %vm221_vm1, %v216_v43, 0.0  ;;  %v235_v63 = vsel %vm221_vm1, %v220_v59, 0.0 }
  0xe3   :  { %v225_v46 = vsel %vm221_vm1, %v215_v44, 0.0  ;;  %v233_v61 = vsel %vm221_vm1, %v219_v56, 0.0 }
  0xe4   :  { %v226_v48 = vadd.f32 %v225_v46, %v224_v41 }
  0xe6   :  { %v228_v54 = vadd.f32 %v227_v50, %v226_v48 }
  0xe8   :  { %v230_v57 = vadd.f32 %v229_v55, %v228_v54 }
  0xea   :  { %v232_v60 = vadd.f32 %v231_v58, %v230_v57 }
  0xec   :  { %v234_v62 = vadd.f32 %v233_v61, %v232_v60 }
  0xee   :  { %v236_v0 = vadd.f32 %v235_v63, %v234_v62 }
  0xf0   :  { %v237_v1 = vrot.slane %v236_v0, 4 }
  0xf2   :  { %v238_v2 = vadd.f32 %v237_v1, %v236_v0 }
  0xf4   :  { %v239_v3 = vrot.slane %v238_v2, 2 }
  0xf6   :  { %v240_v4 = vadd.f32 %v239_v3, %v238_v2 }
  0xf8   :  { %v241_v5 = vrot.slane %v240_v4, 1 }
  0xfa   :  { %v242_v6 = vadd.f32 %v241_v5, %v240_v4 }
  0xfc   :  { %244 = vst.msk [vmem:[#allocation2] sm:$0x1] %vm243_vm2, %v242_v6 }
  0xfd   :  { %308 = shalt.err (!%p305_p4)
}
  0xfe   :  { %s309_s21 = scalar_lea.hbm %s429_s3, 16 }
  0xff   :  { %p310_p5 = scmp.ne.s32.totalorder %s429_s3, %s309_s21  ;;  %p313_p6 = scmp.lt.u32.totalorder %s309_s21, %s429_s3 }
 0x101   :  { %p315_p7 = pnand %p313_p6, %p310_p5 }
 0x103   :  { %318 = shalt.err (!%p315_p7)
}
 0x104   :  { %254 = dma.vmem_to_hbm [thread:$0]  %s252_s17, 16, %s429_s3, [#allocation3]  }
 0x105   :  { %319 = dma.done.wait [#allocation3], 16  }
 0x106   :  { %320 = vsyncadd [#allocation3], 4294967280 }
 0x107   :  { %258 = vsyncpa [#allocation3], 1 }

</bundles_post_ra>
